<compile_context>
chip_gen: v6e
topology: v6e:2x2x1
jax: 0.10.0
libtpu: 0.0.40
codegen_flags: <defaults>
</compile_context>

<pallas_src>
import math

import jax
import jax.numpy as jnp
from jax.experimental import pallas as pl
from jax.experimental.pallas import tpu as pltpu

# ---- problem sizes (small, consistent with the module) ----
B, S, H = 2, 8, 32          # batch, seq len, hidden size
NH, HD = 4, 8               # num_attention_heads, attention_head_size (NH*HD == H)
I = 64                      # intermediate_size
EPS = 1e-12                 # BertLayerNorm eps
BS = B * S                  # flattened (batch*seq) rows
P = NH * BS                 # packed-head rows, ordered (head, batch, seq)
NEG_BIG = -1e30             # additive mask for cross-(head, batch) score entries

# MXU operand dtype. float32 keeps parity with the f32 reference at these toy sizes; set to
# jnp.bfloat16 on v6e/v7x (MXU-only on v5e -- its VPU/EUP have no bf16 path) at production
# shapes. Accumulation stays f32 via preferred_element_type either way.
MXU_DTYPE = jnp.float32


def _mm(a, b):
    return jnp.dot(a.astype(MXU_DTYPE), b.astype(MXU_DTYPE),
                   preferred_element_type=jnp.float32)


def _mm_t(a, b):
    # a @ b.T without materializing a transpose.
    return jax.lax.dot_general(a.astype(MXU_DTYPE), b.astype(MXU_DTYPE),
                               (((1,), (1,)), ((), ())),
                               preferred_element_type=jnp.float32)


def _erf_f32(x):
    # Rational (Cephes-style) erf approximation for f32 -- same algorithm XLA uses on TPU,
    # so this matches torch.erf / jax erf to fp32 precision.
    alpha = (0.00022905065861350646, 0.0034082910107109506, 0.050955695062380861,
             0.18520832239976145, 1.128379143519084)
    beta = (-1.1791602954361697e-7, 0.000023547966471313185, 0.0010179625278914885,
            0.014070470171167667, 0.11098505178285362, 0.49746925110067538, 1.0)
    c = 3.832506856900711  # erfinv(1 - 2^-23)
    x = jnp.clip(x, -c, c)
    x2 = x * x
    p = jnp.full_like(x2, alpha[0])
    for a in alpha[1:]:
        p = p * x2 + a
    q = jnp.full_like(x2, beta[0])
    for b_ in beta[1:]:
        q = q * x2 + b_
    # (x*p)/q -> (x*p) * reciprocal(q): moves the divide off the VALU onto the EUP slot.
    return (x * p) * pl.reciprocal(q, approx=False)


def _gelu(x):
    # gelu(x) = x * 0.5 * (1 + erf(x / sqrt(2)))  (exact erf-based BERT gelu)
    return x * 0.5 * (1.0 + _erf_f32(x * (1.0 / math.sqrt(2.0))))


def _layernorm(x, g, b):
    u = jnp.mean(x, axis=-1, keepdims=True)
    xc = x - u
    s = jnp.mean(xc * xc, axis=-1, keepdims=True)
    return g * (xc * jax.lax.rsqrt(s + EPS)) + b   # rsqrt (EUP) instead of divide/sqrt


def bert_layer_kernel(x_ref, m_ref,
                      wqkv, bqkv, wo, bo, g1, b1,
                      wi, bi, wo2, bo2, g2, b2,
                      out_ref):
    x = x_ref[...]                         # (BS, H) lane-dense activations
    mask = m_ref[...]                      # (P, P) combined additive score mask

    # ---- BertSelfAttention: fused Q/K/V projection (one MXU op) ----
    qkv = _mm(x, wqkv[...]) + bqkv[...]    # (BS, 3H)

    # Pack heads along the sublane axis: row (h, b, s) <- qkv[b*S+s, off + h*HD + d].
    def pack(off):
        return jnp.concatenate(
            [qkv[:, off + h * HD: off + (h + 1) * HD] for h in range(NH)], axis=0)

    qp = pack(0)                           # (P, HD)
    kp = pack(H)                           # (P, HD)
    vp = pack(2 * H)                       # (P, HD)

    # One scores matmul + one 64-lane softmax + one probs@V matmul for all heads/batches.
    scores = _mm_t(qp, kp) * (1.0 / math.sqrt(HD))          # (P, P)
    scores = jnp.clip(scores, -10000.0, 10000.0) + mask     # mask kills cross-(b,h) terms
    scores = scores - jnp.max(scores, axis=-1, keepdims=True)
    e = jnp.exp(scores)
    probs = e * pl.reciprocal(jnp.sum(e, axis=-1, keepdims=True), approx=False)
    # attention dropout is identity in eval mode
    ctx_p = _mm(probs, vp)                                   # (P, HD)

    # Unpack heads back onto the lane axis: (BS, H) with head h at lanes [h*HD, (h+1)*HD).
    ctx = jnp.concatenate(
        [ctx_p[h * BS:(h + 1) * BS, :] for h in range(NH)], axis=1)

    # ---- BertSelfOutput (dense + residual + LayerNorm) ----
    attn = _mm(ctx, wo[...]) + bo[...]
    attn = _layernorm(attn + x, g1[...], b1[...])

    # ---- BertIntermediate (dense + gelu) ----
    inter = _gelu(_mm(attn, wi[...]) + bi[...])

    # ---- BertOutput (dense + residual + LayerNorm) ----
    out = _mm(inter, wo2[...]) + bo2[...]
    out = _layernorm(out + attn, g2[...], b2[...])

    out_ref[...] = out.astype(out_ref.dtype)


@jax.jit
def bert_layer(hidden, mask2d, params):
    (wq, bq, wk, bk, wv, bv, wo, bo, g1, b1, wi, bi, wo2, bo2, g2, b2) = params

    # Fuse the Q/K/V projection weights into one (H, 3H) matmul operand.
    wqkv = jnp.concatenate([wq, wk, wv], axis=1)             # (H, 3H)
    bqkv = jnp.concatenate([bq, bk, bv], axis=1)             # (1, 3H)

    # Combined additive mask in the packed-head score layout (rows/cols ordered
    # (head, batch, seq)): cross-(head, batch) entries get a huge negative value so one
    # softmax over 64 lanes reproduces the per-head softmax exactly; in-block entries carry
    # the user's additive attention mask for the key position.
    idx = jnp.arange(P)
    h_of = idx // BS
    b_of = (idx % BS) // S
    s_of = idx % S
    same_block = (h_of[:, None] == h_of[None, :]) & (b_of[:, None] == b_of[None, :])
    col_mask = mask2d[b_of, s_of]                            # (P,) additive, per key column
    combined_mask = jnp.where(same_block, col_mask[None, :],
                              jnp.float32(NEG_BIG))          # (P, P)

    x2d = hidden.reshape(BS, H)                              # lane-dense activation slab

    in_specs = [pl.BlockSpec(memory_space=pltpu.MemorySpace.VMEM)] * 14
    out2d = pl.pallas_call(
        bert_layer_kernel,
        out_shape=jax.ShapeDtypeStruct((BS, H), jnp.float32),
        in_specs=in_specs,
        out_specs=pl.BlockSpec(memory_space=pltpu.MemorySpace.VMEM),
    )(x2d, combined_mask, wqkv, bqkv, wo, bo, g1, b1, wi, bi, wo2, bo2, g2, b2)

    return out2d.reshape(B, S, H)


def bert_layer_ref(hidden, mask2d, params):
    (wq, bq, wk, bk, wv, bv, wo, bo, g1, b1, wi, bi, wo2, bo2, g2, b2) = params

    def ln(x, g, b):
        u = jnp.mean(x, -1, keepdims=True)
        s = jnp.mean((x - u) ** 2, -1, keepdims=True)
        return g * ((x - u) / jnp.sqrt(s + EPS)) + b

    q = hidden @ wq + bq
    k = hidden @ wk + bk
    v = hidden @ wv + bv
    split = lambda t: t.reshape(B, S, NH, HD).transpose(0, 2, 1, 3)
    qh, kh, vh = split(q), split(k), split(v)
    scores = jnp.einsum('bnqd,bnkd->bnqk', qh, kh) / math.sqrt(HD)
    scores = jnp.clip(scores, -10000.0, 10000.0) + mask2d[:, None, None, :]
    probs = jax.nn.softmax(scores, axis=-1)
    ctx = jnp.einsum('bnqk,bnkd->bnqd', probs, vh).transpose(0, 2, 1, 3).reshape(B, S, H)
    attn = ln(ctx @ wo + bo + hidden, g1, b1)
    inter = jax.nn.gelu(attn @ wi + bi, approximate=False)
    out = ln(inter @ wo2 + bo2 + attn, g2, b2)
    return out


if __name__ == "__main__":
    key = jax.random.PRNGKey(0)
    keys = jax.random.split(key, 8)

    def lin(k, fan_in, fan_out):
        w = jax.random.normal(k, (fan_in, fan_out), jnp.float32) * 0.02
        b = jnp.zeros((1, fan_out), jnp.float32)
        return w, b

    wq, bq = lin(keys[0], H, H)
    wk, bk = lin(keys[1], H, H)
    wv, bv = lin(keys[2], H, H)
    wo, bo = lin(keys[3], H, H)        # attention.output.dense
    wi, bi = lin(keys[4], H, I)        # intermediate.dense
    wo2, bo2 = lin(keys[5], I, H)      # output.dense
    g1, b1 = jnp.ones((1, H), jnp.float32), jnp.zeros((1, H), jnp.float32)
    g2, b2 = jnp.ones((1, H), jnp.float32), jnp.zeros((1, H), jnp.float32)
    params = (wq, bq, wk, bk, wv, bv, wo, bo, g1, b1, wi, bi, wo2, bo2, g2, b2)

    hidden = jax.random.normal(keys[6], (B, S, H), jnp.float32)
    # additive attention mask: batch 0 fully visible, batch 1 last 2 tokens masked
    mask2d = jnp.zeros((B, S), jnp.float32).at[1, -2:].set(-10000.0)

    out = bert_layer(hidden, mask2d, params)
    jax.block_until_ready(out)

    ref = bert_layer_ref(hidden, mask2d, params)
    jax.block_until_ready(ref)

    assert out.shape == (B, S, H)
    assert jnp.allclose(out, ref, rtol=1e-4, atol=1e-4), (
        f"max abs err {jnp.max(jnp.abs(out - ref))}")
    print("KERNEL_OK")
</pallas_src>

<mosaic_0001>
module attributes {stable_mosaic.version = 11 : i64} {
  func.func @bert_layer_kernel(%arg0: memref<16x32xf32, #tpu.memory_space<vmem>>, %arg1: memref<64x64xf32, #tpu.memory_space<vmem>>, %arg2: memref<32x96xf32, #tpu.memory_space<vmem>>, %arg3: memref<1x96xf32, #tpu.memory_space<vmem>>, %arg4: memref<32x32xf32, #tpu.memory_space<vmem>>, %arg5: memref<1x32xf32, #tpu.memory_space<vmem>>, %arg6: memref<1x32xf32, #tpu.memory_space<vmem>>, %arg7: memref<1x32xf32, #tpu.memory_space<vmem>>, %arg8: memref<32x64xf32, #tpu.memory_space<vmem>>, %arg9: memref<1x64xf32, #tpu.memory_space<vmem>>, %arg10: memref<64x32xf32, #tpu.memory_space<vmem>>, %arg11: memref<1x32xf32, #tpu.memory_space<vmem>>, %arg12: memref<1x32xf32, #tpu.memory_space<vmem>>, %arg13: memref<1x32xf32, #tpu.memory_space<vmem>>, %arg14: memref<16x32xf32, #tpu.memory_space<vmem>>) attributes {dimension_semantics = [], scalar_prefetch = 0 : i64, scratch_operands = 0 : i64, tpu.core_type = #tpu.core_type<tc>} {
    %c0 = arith.constant 0 : index
    %c0_0 = arith.constant 0 : index
    %0 = vector.load %arg0[%c0, %c0_0] : memref<16x32xf32, #tpu.memory_space<vmem>>, vector<16x32xf32>
    %c0_1 = arith.constant 0 : index
    %c0_2 = arith.constant 0 : index
    %1 = vector.load %arg1[%c0_1, %c0_2] : memref<64x64xf32, #tpu.memory_space<vmem>>, vector<64x64xf32>
    %c0_3 = arith.constant 0 : index
    %c0_4 = arith.constant 0 : index
    %2 = vector.load %arg2[%c0_3, %c0_4] : memref<32x96xf32, #tpu.memory_space<vmem>>, vector<32x96xf32>
    %cst = arith.constant dense<0.000000e+00> : vector<16x96xf32>
    %3 = tpu.matmul %0, %2, %cst {dimension_numbers = #tpu.dot_dimension_numbers<[1], [0], [0], [1], [0, 0, 1, 1], [], []>} : vector<16x32xf32>, vector<32x96xf32>, vector<16x96xf32> -> vector<16x96xf32>
    %c0_5 = arith.constant 0 : index
    %c0_6 = arith.constant 0 : index
    %4 = vector.load %arg3[%c0_5, %c0_6] : memref<1x96xf32, #tpu.memory_space<vmem>>, vector<1x96xf32>
    %5 = vector.broadcast %4 : vector<1x96xf32> to vector<16x96xf32>
    %6 = arith.addf %3, %5 : vector<16x96xf32>
    %7 = vector.extract_strided_slice %6 {offsets = [0, 0], sizes = [16, 8], strides = [1, 1]} : vector<16x96xf32> to vector<16x8xf32>
    %8 = vector.extract_strided_slice %6 {offsets = [0, 8], sizes = [16, 8], strides = [1, 1]} : vector<16x96xf32> to vector<16x8xf32>
    %9 = vector.extract_strided_slice %6 {offsets = [0, 16], sizes = [16, 8], strides = [1, 1]} : vector<16x96xf32> to vector<16x8xf32>
    %10 = vector.extract_strided_slice %6 {offsets = [0, 24], sizes = [16, 8], strides = [1, 1]} : vector<16x96xf32> to vector<16x8xf32>
    %11 = tpu.concatenate %7, %8, %9, %10 in 0 : vector<16x8xf32>, vector<16x8xf32>, vector<16x8xf32>, vector<16x8xf32> -> vector<64x8xf32>
    %12 = vector.extract_strided_slice %6 {offsets = [0, 32], sizes = [16, 8], strides = [1, 1]} : vector<16x96xf32> to vector<16x8xf32>
    %13 = vector.extract_strided_slice %6 {offsets = [0, 40], sizes = [16, 8], strides = [1, 1]} : vector<16x96xf32> to vector<16x8xf32>
    %14 = vector.extract_strided_slice %6 {offsets = [0, 48], sizes = [16, 8], strides = [1, 1]} : vector<16x96xf32> to vector<16x8xf32>
    %15 = vector.extract_strided_slice %6 {offsets = [0, 56], sizes = [16, 8], strides = [1, 1]} : vector<16x96xf32> to vector<16x8xf32>
    %16 = tpu.concatenate %12, %13, %14, %15 in 0 : vector<16x8xf32>, vector<16x8xf32>, vector<16x8xf32>, vector<16x8xf32> -> vector<64x8xf32>
    %17 = vector.extract_strided_slice %6 {offsets = [0, 64], sizes = [16, 8], strides = [1, 1]} : vector<16x96xf32> to vector<16x8xf32>
    %18 = vector.extract_strided_slice %6 {offsets = [0, 72], sizes = [16, 8], strides = [1, 1]} : vector<16x96xf32> to vector<16x8xf32>
    %19 = vector.extract_strided_slice %6 {offsets = [0, 80], sizes = [16, 8], strides = [1, 1]} : vector<16x96xf32> to vector<16x8xf32>
    %20 = vector.extract_strided_slice %6 {offsets = [0, 88], sizes = [16, 8], strides = [1, 1]} : vector<16x96xf32> to vector<16x8xf32>
    %21 = tpu.concatenate %17, %18, %19, %20 in 0 : vector<16x8xf32>, vector<16x8xf32>, vector<16x8xf32>, vector<16x8xf32> -> vector<64x8xf32>
    %cst_7 = arith.constant dense<0.000000e+00> : vector<64x64xf32>
    %22 = tpu.matmul %11, %16, %cst_7 {dimension_numbers = #tpu.dot_dimension_numbers<[1], [1], [0], [0], [0, 0, 1, 0], [], []>} : vector<64x8xf32>, vector<64x8xf32>, vector<64x64xf32> -> vector<64x64xf32>
    %cst_8 = arith.constant 0.353553385 : f32
    %23 = vector.broadcast %cst_8 : f32 to vector<64x64xf32>
    %24 = arith.mulf %22, %23 : vector<64x64xf32>
    %cst_9 = arith.constant -1.000000e+04 : f32
    %cst_10 = arith.constant 1.000000e+04 : f32
    %25 = vector.broadcast %cst_9 : f32 to vector<64x64xf32>
    %26 = arith.maximumf %25, %24 : vector<64x64xf32>
    %27 = vector.broadcast %cst_10 : f32 to vector<64x64xf32>
    %28 = arith.minimumf %27, %26 : vector<64x64xf32>
    %29 = arith.addf %28, %1 : vector<64x64xf32>
    %cst_11 = arith.constant dense<0xFF800000> : vector<64xf32>
    %30 = vector.multi_reduction <maximumf>, %29, %cst_11 [1] : vector<64x64xf32> to vector<64xf32>
    %31 = vector.shape_cast %30 : vector<64xf32> to vector<64x1xf32>
    %32 = vector.broadcast %31 : vector<64x1xf32> to vector<64x64xf32>
    %33 = arith.subf %29, %32 : vector<64x64xf32>
    %34 = math.exp %33 : vector<64x64xf32>
    %cst_12 = arith.constant dense<0.000000e+00> : vector<64xf32>
    %35 = vector.multi_reduction <add>, %34, %cst_12 [1] : vector<64x64xf32> to vector<64xf32>
    %36 = vector.shape_cast %35 : vector<64xf32> to vector<64x1xf32>
    %37 = tpu.reciprocal %36 : vector<64x1xf32> -> vector<64x1xf32>
    %38 = vector.broadcast %37 : vector<64x1xf32> to vector<64x64xf32>
    %39 = arith.mulf %34, %38 : vector<64x64xf32>
    %cst_13 = arith.constant dense<0.000000e+00> : vector<64x8xf32>
    %40 = tpu.matmul %39, %21, %cst_13 {dimension_numbers = #tpu.dot_dimension_numbers<[1], [0], [0], [1], [0, 0, 1, 1], [], []>} : vector<64x64xf32>, vector<64x8xf32>, vector<64x8xf32> -> vector<64x8xf32>
    %41 = vector.extract_strided_slice %40 {offsets = [0, 0], sizes = [16, 8], strides = [1, 1]} : vector<64x8xf32> to vector<16x8xf32>
    %42 = vector.extract_strided_slice %40 {offsets = [16, 0], sizes = [16, 8], strides = [1, 1]} : vector<64x8xf32> to vector<16x8xf32>
    %43 = vector.extract_strided_slice %40 {offsets = [32, 0], sizes = [16, 8], strides = [1, 1]} : vector<64x8xf32> to vector<16x8xf32>
    %44 = vector.extract_strided_slice %40 {offsets = [48, 0], sizes = [16, 8], strides = [1, 1]} : vector<64x8xf32> to vector<16x8xf32>
    %45 = tpu.concatenate %41, %42, %43, %44 in 1 : vector<16x8xf32>, vector<16x8xf32>, vector<16x8xf32>, vector<16x8xf32> -> vector<16x32xf32>
    %c0_14 = arith.constant 0 : index
    %c0_15 = arith.constant 0 : index
    %46 = vector.load %arg4[%c0_14, %c0_15] : memref<32x32xf32, #tpu.memory_space<vmem>>, vector<32x32xf32>
    %cst_16 = arith.constant dense<0.000000e+00> : vector<16x32xf32>
    %47 = tpu.matmul %45, %46, %cst_16 {dimension_numbers = #tpu.dot_dimension_numbers<[1], [0], [0], [1], [0, 0, 1, 1], [], []>} : vector<16x32xf32>, vector<32x32xf32>, vector<16x32xf32> -> vector<16x32xf32>
    %c0_17 = arith.constant 0 : index
    %c0_18 = arith.constant 0 : index
    %48 = vector.load %arg5[%c0_17, %c0_18] : memref<1x32xf32, #tpu.memory_space<vmem>>, vector<1x32xf32>
    %49 = vector.broadcast %48 : vector<1x32xf32> to vector<16x32xf32>
    %50 = arith.addf %47, %49 : vector<16x32xf32>
    %51 = arith.addf %50, %0 : vector<16x32xf32>
    %c0_19 = arith.constant 0 : index
    %c0_20 = arith.constant 0 : index
    %52 = vector.load %arg6[%c0_19, %c0_20] : memref<1x32xf32, #tpu.memory_space<vmem>>, vector<1x32xf32>
    %c0_21 = arith.constant 0 : index
    %c0_22 = arith.constant 0 : index
    %53 = vector.load %arg7[%c0_21, %c0_22] : memref<1x32xf32, #tpu.memory_space<vmem>>, vector<1x32xf32>
    %cst_23 = arith.constant dense<0.000000e+00> : vector<16xf32>
    %54 = vector.multi_reduction <add>, %51, %cst_23 [1] : vector<16x32xf32> to vector<16xf32>
    %55 = vector.shape_cast %54 : vector<16xf32> to vector<16x1xf32>
    %cst_24 = arith.constant 3.200000e+01 : f32
    %56 = vector.broadcast %cst_24 : f32 to vector<16x1xf32>
    %57 = arith.divf %55, %56 : vector<16x1xf32>
    %58 = vector.broadcast %57 : vector<16x1xf32> to vector<16x32xf32>
    %59 = arith.subf %51, %58 : vector<16x32xf32>
    %60 = arith.mulf %59, %59 : vector<16x32xf32>
    %cst_25 = arith.constant dense<0.000000e+00> : vector<16xf32>
    %61 = vector.multi_reduction <add>, %60, %cst_25 [1] : vector<16x32xf32> to vector<16xf32>
    %62 = vector.shape_cast %61 : vector<16xf32> to vector<16x1xf32>
    %cst_26 = arith.constant 3.200000e+01 : f32
    %63 = vector.broadcast %cst_26 : f32 to vector<16x1xf32>
    %64 = arith.divf %62, %63 : vector<16x1xf32>
    %cst_27 = arith.constant 9.99999996E-13 : f32
    %65 = vector.broadcast %cst_27 : f32 to vector<16x1xf32>
    %66 = arith.addf %64, %65 : vector<16x1xf32>
    %67 = math.rsqrt %66 : vector<16x1xf32>
    %68 = vector.broadcast %67 : vector<16x1xf32> to vector<16x32xf32>
    %69 = arith.mulf %59, %68 : vector<16x32xf32>
    %70 = vector.broadcast %52 : vector<1x32xf32> to vector<16x32xf32>
    %71 = arith.mulf %70, %69 : vector<16x32xf32>
    %72 = vector.broadcast %53 : vector<1x32xf32> to vector<16x32xf32>
    %73 = arith.addf %71, %72 : vector<16x32xf32>
    %c0_28 = arith.constant 0 : index
    %c0_29 = arith.constant 0 : index
    %74 = vector.load %arg8[%c0_28, %c0_29] : memref<32x64xf32, #tpu.memory_space<vmem>>, vector<32x64xf32>
    %cst_30 = arith.constant dense<0.000000e+00> : vector<16x64xf32>
    %75 = tpu.matmul %73, %74, %cst_30 {dimension_numbers = #tpu.dot_dimension_numbers<[1], [0], [0], [1], [0, 0, 1, 1], [], []>} : vector<16x32xf32>, vector<32x64xf32>, vector<16x64xf32> -> vector<16x64xf32>
    %c0_31 = arith.constant 0 : index
    %c0_32 = arith.constant 0 : index
    %76 = vector.load %arg9[%c0_31, %c0_32] : memref<1x64xf32, #tpu.memory_space<vmem>>, vector<1x64xf32>
    %77 = vector.broadcast %76 : vector<1x64xf32> to vector<16x64xf32>
    %78 = arith.addf %75, %77 : vector<16x64xf32>
    %cst_33 = arith.constant 5.000000e-01 : f32
    %79 = vector.broadcast %cst_33 : f32 to vector<16x64xf32>
    %80 = arith.mulf %78, %79 : vector<16x64xf32>
    %cst_34 = arith.constant 0.707106769 : f32
    %81 = vector.broadcast %cst_34 : f32 to vector<16x64xf32>
    %82 = arith.mulf %78, %81 : vector<16x64xf32>
    %cst_35 = arith.constant -3.8325069 : f32
    %cst_36 = arith.constant 3.8325069 : f32
    %83 = vector.broadcast %cst_35 : f32 to vector<16x64xf32>
    %84 = arith.maximumf %83, %82 : vector<16x64xf32>
    %85 = vector.broadcast %cst_36 : f32 to vector<16x64xf32>
    %86 = arith.minimumf %85, %84 : vector<16x64xf32>
    %87 = arith.mulf %86, %86 : vector<16x64xf32>
    %cst_37 = arith.constant 2.29050653E-4 : f32
    %88 = vector.broadcast %cst_37 : f32 to vector<16x64xf32>
    %89 = arith.mulf %88, %87 : vector<16x64xf32>
    %cst_38 = arith.constant 0.00340829091 : f32
    %90 = vector.broadcast %cst_38 : f32 to vector<16x64xf32>
    %91 = arith.addf %89, %90 : vector<16x64xf32>
    %92 = arith.mulf %91, %87 : vector<16x64xf32>
    %cst_39 = arith.constant 0.0509556942 : f32
    %93 = vector.broadcast %cst_39 : f32 to vector<16x64xf32>
    %94 = arith.addf %92, %93 : vector<16x64xf32>
    %95 = arith.mulf %94, %87 : vector<16x64xf32>
    %cst_40 = arith.constant 0.185208321 : f32
    %96 = vector.broadcast %cst_40 : f32 to vector<16x64xf32>
    %97 = arith.addf %95, %96 : vector<16x64xf32>
    %98 = arith.mulf %97, %87 : vector<16x64xf32>
    %cst_41 = arith.constant 1.12837911 : f32
    %99 = vector.broadcast %cst_41 : f32 to vector<16x64xf32>
    %100 = arith.addf %98, %99 : vector<16x64xf32>
    %cst_42 = arith.constant -1.17916031E-7 : f32
    %101 = vector.broadcast %cst_42 : f32 to vector<16x64xf32>
    %102 = arith.mulf %101, %87 : vector<16x64xf32>
    %cst_43 = arith.constant 2.35479656E-5 : f32
    %103 = vector.broadcast %cst_43 : f32 to vector<16x64xf32>
    %104 = arith.addf %102, %103 : vector<16x64xf32>
    %105 = arith.mulf %104, %87 : vector<16x64xf32>
    %cst_44 = arith.constant 0.00101796258 : f32
    %106 = vector.broadcast %cst_44 : f32 to vector<16x64xf32>
    %107 = arith.addf %105, %106 : vector<16x64xf32>
    %108 = arith.mulf %107, %87 : vector<16x64xf32>
    %cst_45 = arith.constant 0.0140704699 : f32
    %109 = vector.broadcast %cst_45 : f32 to vector<16x64xf32>
    %110 = arith.addf %108, %109 : vector<16x64xf32>
    %111 = arith.mulf %110, %87 : vector<16x64xf32>
    %cst_46 = arith.constant 0.110985048 : f32
    %112 = vector.broadcast %cst_46 : f32 to vector<16x64xf32>
    %113 = arith.addf %111, %112 : vector<16x64xf32>
    %114 = arith.mulf %113, %87 : vector<16x64xf32>
    %cst_47 = arith.constant 0.497469246 : f32
    %115 = vector.broadcast %cst_47 : f32 to vector<16x64xf32>
    %116 = arith.addf %114, %115 : vector<16x64xf32>
    %117 = arith.mulf %116, %87 : vector<16x64xf32>
    %cst_48 = arith.constant 1.000000e+00 : f32
    %118 = vector.broadcast %cst_48 : f32 to vector<16x64xf32>
    %119 = arith.addf %117, %118 : vector<16x64xf32>
    %120 = arith.mulf %86, %100 : vector<16x64xf32>
    %121 = tpu.reciprocal %119 : vector<16x64xf32> -> vector<16x64xf32>
    %122 = arith.mulf %120, %121 : vector<16x64xf32>
    %cst_49 = arith.constant 1.000000e+00 : f32
    %123 = vector.broadcast %cst_49 : f32 to vector<16x64xf32>
    %124 = arith.addf %123, %122 : vector<16x64xf32>
    %125 = arith.mulf %80, %124 : vector<16x64xf32>
    %c0_50 = arith.constant 0 : index
    %c0_51 = arith.constant 0 : index
    %126 = vector.load %arg10[%c0_50, %c0_51] : memref<64x32xf32, #tpu.memory_space<vmem>>, vector<64x32xf32>
    %cst_52 = arith.constant dense<0.000000e+00> : vector<16x32xf32>
    %127 = tpu.matmul %125, %126, %cst_52 {dimension_numbers = #tpu.dot_dimension_numbers<[1], [0], [0], [1], [0, 0, 1, 1], [], []>} : vector<16x64xf32>, vector<64x32xf32>, vector<16x32xf32> -> vector<16x32xf32>
    %c0_53 = arith.constant 0 : index
    %c0_54 = arith.constant 0 : index
    %128 = vector.load %arg11[%c0_53, %c0_54] : memref<1x32xf32, #tpu.memory_space<vmem>>, vector<1x32xf32>
    %129 = vector.broadcast %128 : vector<1x32xf32> to vector<16x32xf32>
    %130 = arith.addf %127, %129 : vector<16x32xf32>
    %131 = arith.addf %130, %73 : vector<16x32xf32>
    %c0_55 = arith.constant 0 : index
    %c0_56 = arith.constant 0 : index
    %132 = vector.load %arg12[%c0_55, %c0_56] : memref<1x32xf32, #tpu.memory_space<vmem>>, vector<1x32xf32>
    %c0_57 = arith.constant 0 : index
    %c0_58 = arith.constant 0 : index
    %133 = vector.load %arg13[%c0_57, %c0_58] : memref<1x32xf32, #tpu.memory_space<vmem>>, vector<1x32xf32>
    %cst_59 = arith.constant dense<0.000000e+00> : vector<16xf32>
    %134 = vector.multi_reduction <add>, %131, %cst_59 [1] : vector<16x32xf32> to vector<16xf32>
    %135 = vector.shape_cast %134 : vector<16xf32> to vector<16x1xf32>
    %cst_60 = arith.constant 3.200000e+01 : f32
    %136 = vector.broadcast %cst_60 : f32 to vector<16x1xf32>
    %137 = arith.divf %135, %136 : vector<16x1xf32>
    %138 = vector.broadcast %137 : vector<16x1xf32> to vector<16x32xf32>
    %139 = arith.subf %131, %138 : vector<16x32xf32>
    %140 = arith.mulf %139, %139 : vector<16x32xf32>
    %cst_61 = arith.constant dense<0.000000e+00> : vector<16xf32>
    %141 = vector.multi_reduction <add>, %140, %cst_61 [1] : vector<16x32xf32> to vector<16xf32>
    %142 = vector.shape_cast %141 : vector<16xf32> to vector<16x1xf32>
    %cst_62 = arith.constant 3.200000e+01 : f32
    %143 = vector.broadcast %cst_62 : f32 to vector<16x1xf32>
    %144 = arith.divf %142, %143 : vector<16x1xf32>
    %cst_63 = arith.constant 9.99999996E-13 : f32
    %145 = vector.broadcast %cst_63 : f32 to vector<16x1xf32>
    %146 = arith.addf %144, %145 : vector<16x1xf32>
    %147 = math.rsqrt %146 : vector<16x1xf32>
    %148 = vector.broadcast %147 : vector<16x1xf32> to vector<16x32xf32>
    %149 = arith.mulf %139, %148 : vector<16x32xf32>
    %150 = vector.broadcast %132 : vector<1x32xf32> to vector<16x32xf32>
    %151 = arith.mulf %150, %149 : vector<16x32xf32>
    %152 = vector.broadcast %133 : vector<1x32xf32> to vector<16x32xf32>
    %153 = arith.addf %151, %152 : vector<16x32xf32>
    %c0_64 = arith.constant 0 : index
    %c0_65 = arith.constant 0 : index
    %154 = vector.load %arg14[%c0_64, %c0_65] : memref<16x32xf32, #tpu.memory_space<vmem>>, vector<16x32xf32>
    tpu.vector_store %arg14[%c0_64, %c0_65], %153 {strides = array<i32>} : memref<16x32xf32, #tpu.memory_space<vmem>>, vector<16x32xf32>,
    return
  }
}

</mosaic_0001>

<bundles_post_ra>
// kernel: bert_layer.1
= control target key start
LH: loop header
LB: loop body
LE: loop exit
PB: predicated region body
PF: predicated region fallthrough
CT: control target
= control target key end

     0   :  { %vm69_vm0 = vcmask 261120   ;;  %s1741_s0 = inlined_call_operand.vmem [shape: f32[16,32], index: 0, kind: input, shape index: {}]   ;;  %s1742_s1 = inlined_call_operand.vmem [shape: f32[64,64], index: 1, kind: input, shape index: {}]   ;;  %s1743_s2 = inlined_call_operand.vmem [shape: f32[32,96], index: 2, kind: input, shape index: {}]   ;;  %s1744_s3 = inlined_call_operand.vmem [shape: f32[1,96], index: 3, kind: input, shape index: {}]   ;;  %s1745_s4 = inlined_call_operand.vmem [shape: f32[32,32], index: 4, kind: input, shape index: {}]   ;;  %s1746_s5 = inlined_call_operand.vmem [shape: f32[1,32], index: 5, kind: input, shape index: {}]   ;;  %s1747_s6 = inlined_call_operand.vmem [shape: f32[1,32], index: 6, kind: input, shape index: {}]   ;;  %s1748_s7 = inlined_call_operand.vmem [shape: f32[1,32], index: 7, kind: input, shape index: {}]   ;;  %s1749_s8 = inlined_call_operand.vmem [shape: f32[32,64], index: 8, kind: input, shape index: {}]   ;;  %s1750_s9 = inlined_call_operand.vmem [shape: f32[1,64], index: 9, kind: input, shape index: {}]   ;;  %s1751_s10 = inlined_call_operand.vmem [shape: f32[64,32], index: 10, kind: input, shape index: {}]   ;;  %s1752_s11 = inlined_call_operand.vmem [shape: f32[1,32], index: 11, kind: input, shape index: {}]   ;;  %s1753_s12 = inlined_call_operand.vmem [shape: f32[1,32], index: 12, kind: input, shape index: {}]   ;;  %s1754_s13 = inlined_call_operand.vmem [shape: f32[1,32], index: 13, kind: input, shape index: {}]   ;;  %s1755_s14 = inlined_call_operand.hbm [shape: f32[16,32], index: 14, kind: output, shape index: {}]  }
   0x1   :  { %v61_v0 = vld [vmem:[%s1743_s2 + $0x18] sm:$0xff]  ;;  %v60_v1 = vld [vmem:[%s1743_s2 + $0x10] sm:$0xff]  ;;  %v1464_v2 = vld [vmem:[%s1741_s0] sm:$0xff] }
   0x2   :  { %1186 = vmatprep.subr.mxu0 %v61_v0  ;;  %v59_v3 = vld [vmem:[%s1743_s2 + $0x8] sm:$0xff]  ;;  %1194 = vmatprep.mubr.msk.f32.mxu0 %vm69_vm0, %v1464_v2 }
   0x3   :  { %1187 = vmatpush3.msra.mxu0 %v61_v0 }
   0x4   :  { %19 = vsyncpa [#allocation3], 0  ;;  %1188 = vmatprep.subr.mxu0 %v60_v1  ;;  %v58_v4 = vld [vmem:[%s1743_s2] sm:$0xff]  ;;  %v1477_v5 = vld [vmem:[%s1741_s0 + $0x8] sm:$0xff]  ;;  %vm181_vm1 = vcmask 64512   ;;  %s1370_s2 = smov 112  }
   0x5   :  { %1189 = vmatpush3.msra.mxu0 %v60_v1  ;;  %v1076_v6 = vld [vmem:[%s1744_s3] ss:$0 sm:$0xff]  ;;  %s1371_s0 = smov 104   ;;  %s1372_s3 = smov 120   ;;  %v51_v28 = vld [vmem:[%s1742_s1 + $0x8] sm:$0xff]  ;;  %vm351_vm2 = vcmask 523264  }
   0x6   :  { %1190 = vmatprep.subr.mxu0 %v59_v3  ;;  %s1373_s27 = smov 96   ;;  %v50_v32 = vld [vmem:[%s1742_s1] sm:$0xff]  ;;  %v52_v42 = vld [vmem:[%s1742_s1 + $0x10] sm:$0xff]  ;;  %v53_v46 = vld [vmem:[%s1742_s1 + $0x18] sm:$0xff]  ;;  %s1374_s26 = smov 64   ;;  %vm619_vm3 = vcmask 130048  }
   0x7   :  { %1191 = vmatpush3.msra.mxu0 %v59_v3  ;;  %v54_v52 = vld [vmem:[%s1742_s1 + $0x20] sm:$0xff]  ;;  %v55_v57 = vld [vmem:[%s1742_s1 + $0x28] sm:$0xff]  ;;  %v57_v63 = vld [vmem:[%s1742_s1 + $0x38] sm:$0xff]  ;;  %s1375_s17 = smov 8   ;;  %s1376_s18 = smov 16   ;;  %vm622_vm4 = vcmask 195584  }
   0x8   :  { %1192 = vmatprep.subr.mxu0 %v58_v4  ;;  %s1377_s19 = smov 24  }
   0x9   :  { %1193 = vmatpush3.msra.mxu0 %v58_v4 }
   0xa   :  { %1195 = vmatmul.mubr.msk.f32.vlgmr.msra.gmra.mxu0 %vm69_vm0, %v1477_v5 }
  0xca   :  { %v1196_v7 = vpop.f32.mrf.mxu0 }
  0xcb   :  { %v1484_v8 = vadd.f32 %v1196_v7, %v1076_v6 }
  0xcc   :  { %v142_v9 = vpop.f32.mrf.mxu0 }
  0xcd   :  { %v1486_v10 = vadd.f32 %v1076_v6, %v142_v9  ;;  %159 = vrot.lane.b32.xlu1 %v1484_v8, %s1370_s2  ;;  %163 = vrot.lane.b32.xlu0 %v1484_v8, %s1371_s0  ;;  %v56_v9 = vld [vmem:[%s1742_s1 + $0x30] sm:$0xff]  ;;  %s1378_s1 = smov [#allocation2]  }
  0xcf   :  { %1213 = vmatprep.mubr.msk.f32.mxu1 %vm181_vm1, %v1486_v10 }
  0xd1   :  { %157 = vrot.lane.b32.xlu1 %v1486_v10, %s1370_s2  ;;  %161 = vrot.lane.b32.xlu0 %v1486_v10, %s1371_s0 }
  0xd5   :  { %153 = vrot.lane.b32.xlu1 %v1486_v10, %s1372_s3  ;;  %155 = vrot.lane.b32.xlu0 %v1484_v8, %s1372_s3  ;;  %s1065_s3 = sshll.u32 %s1378_s1, 4  ;;  %s1066_s3 = int_to_ptr.vmem [resolvable:$true] %s1065_s3 }
  0xd6   :  { %p1353_p1 = scmp.lt.s32.totalorder %s1066_s3, %s1066_s3 }
 0x13f   :  { %v1496_v11 = vpop.permute.xlu1 %159  ;;  %v1498_v12 = vpop.permute.xlu0 %163 }
 0x140   :  { %179 = vrot.lane.b32.xlu0 %v1498_v12, %s1373_s27 }
 0x143   :  { %v1501_v13 = vpop.permute.xlu0 %161  ;;  %v1505_v14 = vpop.permute.xlu1 %157 }
 0x144   :  { %175 = vrot.lane.b32.xlu0 %v1496_v11, %s1373_s27  ;;  %177 = vrot.lane.b32.xlu1 %v1501_v13, %s1373_s27 }
 0x147   :  { %v1507_v15 = vpop.permute.xlu0 %155  ;;  %v1511_v16 = vpop.permute.xlu1 %153 }
 0x148   :  { %173 = vrot.lane.b32.xlu1 %v1505_v14, %s1373_s27  ;;  %171 = vrot.lane.b32.xlu0 %v1507_v15, %s1373_s27 }
 0x14c   :  { %169 = vrot.lane.b32.xlu1 %v1511_v16, %s1373_s27  ;;  %167 = vrot.lane.b32.xlu0 %v1484_v8, %s1373_s27 }
 0x150   :  { %165 = vrot.lane.b32.xlu1 %v1486_v10, %s1373_s27  ;;  %s1348_s27 = scalar_lea.vmem %s1066_s3, 256 }
 0x151   :  { %p1349_p0 = scmp.ne.s32.totalorder %s1066_s3, %s1348_s27  ;;  %p1354_p2 = scmp.lt.s32.totalorder %s1348_s27, %s1348_s27 }
 0x153   :  { %p1355_p3 = por %p1354_p2, %p1353_p1 }
 0x155   :  { %p1356_p4 = pnand %p1355_p3, %p1349_p0 }
 0x1b2   :  { %v180_v17 = vpop.permute.xlu0 %179 }
 0x1b3   :  { %1197 = vmatprep.subr.msk.mxu1 %vm181_vm1, %v180_v17 }
 0x1b4   :  { %1198 = vmatpush3.xpose.msk.msra.mxu1 %vm181_vm1, %v180_v17 }
 0x1b6   :  { %v178_v18 = vpop.permute.xlu1 %177  ;;  %v176_v19 = vpop.permute.xlu0 %175 }
 0x1b7   :  { %1199 = vmatprep.subr.msk.mxu1 %vm181_vm1, %v178_v18 }
 0x1b8   :  { %1200 = vmatpush3.xpose.msk.msra.mxu1 %vm181_vm1, %v178_v18 }
 0x1b9   :  { %1201 = vmatprep.subr.msk.mxu1 %vm181_vm1, %v176_v19 }
 0x1ba   :  { %v174_v20 = vpop.permute.xlu1 %173  ;;  %v172_v21 = vpop.permute.xlu0 %171 }
 0x1bc   :  { %1202 = vmatpush3.xpose.msk.msra.mxu1 %vm181_vm1, %v176_v19 }
 0x1bd   :  { %1203 = vmatprep.subr.msk.mxu1 %vm181_vm1, %v174_v20 }
 0x1be   :  { %v170_v22 = vpop.permute.xlu1 %169  ;;  %v168_v23 = vpop.permute.xlu0 %167 }
 0x1c0   :  { %1204 = vmatpush3.xpose.msk.msra.mxu1 %vm181_vm1, %v174_v20 }
 0x1c1   :  { %1205 = vmatprep.subr.msk.mxu1 %vm181_vm1, %v172_v21 }
 0x1c2   :  { %v166_v24 = vpop.permute.xlu1 %165 }
 0x1c4   :  { %1206 = vmatpush3.xpose.msk.msra.mxu1 %vm181_vm1, %v172_v21 }
 0x1c5   :  { %1207 = vmatprep.subr.msk.mxu1 %vm181_vm1, %v170_v22 }
 0x1c8   :  { %1208 = vmatpush3.xpose.msk.msra.mxu1 %vm181_vm1, %v170_v22 }
 0x1c9   :  { %1209 = vmatprep.subr.msk.mxu1 %vm181_vm1, %v168_v23 }
 0x1cc   :  { %1210 = vmatpush3.xpose.msk.msra.mxu1 %vm181_vm1, %v168_v23 }
 0x1cd   :  { %1211 = vmatprep.subr.msk.mxu1 %vm181_vm1, %v166_v24 }
 0x1d0   :  { %1212 = vmatpush3.xpose.msk.msra.mxu1 %vm181_vm1, %v166_v24 }
 0x1d3   :  { %1214 = vmatmul.mubr.msk.f32.vlgmr.msra.gmra.mxu1 %vm181_vm1, %v1484_v8 }
 0x1d4   :  { %1216 = vmatprep.mubr.msk.f32.mxu1 %vm181_vm1, %v1511_v16 }
 0x1d7   :  { %1217 = vmatmul.mubr.msk.f32.gmra.mxu1 %vm181_vm1, %v1507_v15 }
 0x1d8   :  { %1219 = vmatprep.mubr.msk.f32.mxu1 %vm181_vm1, %v1505_v14 }
 0x1db   :  { %1220 = vmatmul.mubr.msk.f32.gmra.mxu1 %vm181_vm1, %v1496_v11 }
 0x1dc   :  { %1222 = vmatprep.mubr.msk.f32.mxu1 %vm181_vm1, %v1501_v13 }
 0x1df   :  { %1223 = vmatmul.mubr.msk.f32.gmra.mxu1 %vm181_vm1, %v1498_v12 }
 0x293   :  { %v1215_v25 = vpop.f32.mrf.mxu1 }
 0x294   :  { %v320_v26 = vmul.f32 0.35355338, %v1215_v25 }
 0x295   :  { %v280_v27 = vpop.f32.mrf.mxu1 }
 0x296   :  { %v1096_v29 = vclamps-f32 %v320_v26, 10000.0  ;;  %v319_v30 = vmul.f32 0.35355338, %v280_v27 }
 0x297   :  { %v1218_v31 = vpop.f32.mrf.mxu1 }
 0x298   :  { %v1095_v33 = vclamps-f32 %v319_v30, 10000.0  ;;  %v322_v34 = vmul.f32 0.35355338, %v1218_v31  ;;  %v344_v35 = vadd.f32 %v1096_v29, %v51_v28 }
 0x299   :  { %v290_v36 = vpop.f32.mrf.mxu1 }
 0x29a   :  { %v321_v37 = vmul.f32 0.35355338, %v290_v36  ;;  %v355_v38 = vsel %vm351_vm2, %v344_v35, -inf  ;;  %v343_v39 = vadd.f32 %v1095_v33, %v50_v32  ;;  %v1098_v40 = vclamps-f32 %v322_v34, 10000.0 }
 0x29b   :  { %356 = vmax.xlane.f32.xlu1 %v355_v38  ;;  %v1221_v41 = vpop.f32.mrf.mxu1 }
 0x29c   :  { %v1097_v43 = vclamps-f32 %v321_v37, 10000.0  ;;  %v324_v44 = vmul.f32 0.35355338, %v1221_v41  ;;  %v352_v45 = vsel %vm351_vm2, %v343_v39, -inf  ;;  %v346_v51 = vadd.f32 %v1098_v40, %v53_v46 }
 0x29d   :  { %353 = vmax.xlane.f32.xlu0 %v352_v45  ;;  %v300_v47 = vpop.f32.mrf.mxu1 }
 0x29e   :  { %v323_v48 = vmul.f32 0.35355338, %v300_v47  ;;  %v345_v49 = vadd.f32 %v1097_v43, %v52_v42  ;;  %v1100_v53 = vclamps-f32 %v324_v44, 10000.0  ;;  %v361_v60 = vsel %vm351_vm2, %v346_v51, -inf }
 0x29f   :  { %v1224_v50 = vpop.f32.mrf.mxu1 }
 0x2a0   :  { %v1099_v54 = vclamps-f32 %v323_v48, 10000.0  ;;  %v326_v55 = vmul.f32 0.35355338, %v1224_v50  ;;  %v358_v56 = vsel %vm351_vm2, %v345_v49, -inf  ;;  %v348_v62 = vadd.f32 %v1100_v53, %v55_v57 }
 0x2a1   :  { %359 = vmax.xlane.f32.xlu0 %v358_v56  ;;  %v310_v4 = vpop.f32.mrf.mxu1 }
 0x2a2   :  { %v347_v58 = vadd.f32 %v1099_v54, %v54_v52  ;;  %v1102_v59 = vclamps-f32 %v326_v55, 10000.0  ;;  %v367_v0 = vsel %vm351_vm2, %v348_v62, -inf  ;;  %v325_v6 = vmul.f32 0.35355338, %v310_v4 }
 0x2a4   :  { %v364_v61 = vsel %vm351_vm2, %v347_v58, -inf  ;;  %v350_v1 = vadd.f32 %v1102_v59, %v57_v63  ;;  %v1101_v7 = vclamps-f32 %v325_v6, 10000.0 }
 0x2a5   :  { %362 = vmax.xlane.f32.xlu0 %v361_v60  ;;  %365 = vmax.xlane.f32.xlu1 %v364_v61 }
 0x2a6   :  { %v373_v3 = vsel %vm351_vm2, %v350_v1, -inf  ;;  %v1585_v17 = vadd.f32 %v1101_v7, %v56_v9 }
 0x2a9   :  { %368 = vmax.xlane.f32.xlu0 %v367_v0 }
 0x2ad   :  { %374 = vmax.xlane.f32.xlu0 %v373_v3 }
 0x2b6   :  { %454 = vrot.lane.b32.xlu1 %v1498_v12, %s1374_s26  ;;  %v370_v12 = vsel %vm351_vm2, %v1585_v17, -inf }
 0x2ba   :  { %450 = vrot.lane.b32.xlu1 %v1496_v11, %s1374_s26 }
 0x2c3   :  { %452 = vrot.lane.b32.xlu0 %v1501_v13, %s1374_s26 }
 0x2c7   :  { %446 = vrot.lane.b32.xlu0 %v1507_v15, %s1374_s26 }
 0x2de   :  { %371 = vmax.xlane.f32.xlu1 %v370_v12 }
 0x2ef   :  { %448 = vrot.lane.b32.xlu1 %v1505_v14, %s1374_s26 }
 0x2f3   :  { %444 = vrot.lane.b32.xlu1 %v1511_v16, %s1374_s26 }
 0x324   :  { %v357_v11 = vpop.xlane.xlu1 %356 }
 0x325   :  { %v377_v13 = vsub.f32 %v344_v35, %v357_v11 }
 0x326   :  { %v354_v15 = vpop.xlane.xlu0 %353 }
 0x327   :  { %v386_v18 = vmul.f32 1.442695, %v377_v13  ;;  %v376_v19 = vsub.f32 %v343_v39, %v354_v15 }
 0x329   :  { %1304 = vpow2.f32 %v386_v18  ;;  %v384_v20 = vmul.f32 1.442695, %v376_v19 }
 0x32a   :  { %v360_v21 = vpop.xlane.xlu0 %359 }
 0x32b   :  { %1306 = vpow2.f32 %v384_v20  ;;  %v378_v22 = vsub.f32 %v345_v49, %v360_v21 }
 0x32d   :  { %v388_v23 = vmul.f32 1.442695, %v378_v22 }
 0x32e   :  { %v363_v24 = vpop.xlane.xlu0 %362  ;;  %v366_v25 = vpop.xlane.xlu1 %365 }
 0x32f   :  { %1308 = vpow2.f32 %v388_v23  ;;  %v379_v26 = vsub.f32 %v346_v51, %v363_v24  ;;  %v380_v27 = vsub.f32 %v347_v58, %v366_v25  ;;  %v628_v25 = vld [vmem:[%s1745_s4 + $0x18] sm:$0xff] }
 0x331   :  { %v390_v14 = vmul.f32 1.442695, %v379_v26  ;;  %v392_v28 = vmul.f32 1.442695, %v380_v27  ;;  %v627_v26 = vld [vmem:[%s1745_s4 + $0x10] sm:$0xff]  ;;  %v626_v27 = vld [vmem:[%s1745_s4 + $0x8] sm:$0xff] }
 0x332   :  { %v369_v29 = vpop.xlane.xlu0 %368  ;;  %v455_v16 = vpop.permute.xlu1 %454 }
 0x333   :  { %1310 = vpow2.f32 %v390_v14  ;;  %v381_v30 = vsub.f32 %v348_v62, %v369_v29  ;;  %1225 = vmatprep.subr.mxu0 %v455_v16  ;;  %v625_v14 = vld [vmem:[%s1745_s4] sm:$0xff] }
 0x334   :  { %1312 = vpow2.f32 %v392_v28  ;;  %1226 = vmatpush3.msra.mxu0 %v455_v16 }
 0x335   :  { %v394_v31 = vmul.f32 1.442695, %v381_v30 }
 0x336   :  { %v1593_v32 = vpop.eup %1304  ;;  %v375_v33 = vpop.xlane.xlu0 %374 }
 0x337   :  { %1314 = vpow2.f32 %v394_v31  ;;  %v383_v34 = vsub.f32 %v350_v1, %v375_v33  ;;  %v403_v35 = vsel %vm351_vm2, %v1593_v32, 0.0  ;;  %v451_v41 = vpop.permute.xlu1 %450 }
 0x338   :  { %v1307_v36 = vpop.eup %1306  ;;  %404 = vadd.xlane.f32.xlu0 %v403_v35 }
 0x339   :  { %v398_v37 = vmul.f32 1.442695, %v383_v34  ;;  %v400_v38 = vsel %vm351_vm2, %v1307_v36, 0.0 }
 0x33a   :  { %v453_v39 = vpop.permute.xlu0 %452  ;;  %401 = vadd.xlane.f32.xlu1 %v400_v38 }
 0x33b   :  { %1316 = vpow2.f32 %v398_v37  ;;  %1227 = vmatprep.subr.mxu0 %v453_v39 }
 0x33c   :  { %v1598_v40 = vpop.eup %1308  ;;  %1228 = vmatpush3.msra.mxu0 %v453_v39 }
 0x33d   :  { %1229 = vmatprep.subr.mxu0 %v451_v41  ;;  %v406_v42 = vsel %vm351_vm2, %v1598_v40, 0.0 }
 0x33e   :  { %1230 = vmatpush3.msra.mxu0 %v451_v41  ;;  %407 = vadd.xlane.f32.xlu1 %v406_v42  ;;  %v447_v55 = vpop.permute.xlu0 %446 }
 0x340   :  { %v1602_v43 = vpop.eup %1310 }
 0x341   :  { %v1604_v44 = vpop.eup %1312  ;;  %v409_v45 = vsel %vm351_vm2, %v1602_v43, 0.0 }
 0x342   :  { %410 = vadd.xlane.f32.xlu0 %v409_v45  ;;  %v412_v46 = vsel %vm351_vm2, %v1604_v44, 0.0 }
 0x343   :  { %413 = vadd.xlane.f32.xlu1 %v412_v46 }
 0x344   :  { %v1610_v47 = vpop.eup %1314 }
 0x345   :  { %v415_v48 = vsel %vm351_vm2, %v1610_v47, 0.0 }
 0x346   :  { %416 = vadd.xlane.f32.xlu0 %v415_v48 }
 0x348   :  { %v1614_v49 = vpop.eup %1316 }
 0x349   :  { %v421_v50 = vsel %vm351_vm2, %v1614_v49, 0.0 }
 0x34a   :  { %422 = vadd.xlane.f32.xlu0 %v421_v50 }
 0x360   :  { %442 = vrot.lane.b32.xlu0 %v1484_v8, %s1374_s26 }
 0x367   :  { %v372_v51 = vpop.xlane.xlu1 %371 }
 0x368   :  { %v382_v52 = vsub.f32 %v1585_v17, %v372_v51 }
 0x36a   :  { %v396_v53 = vmul.f32 1.442695, %v382_v52 }
 0x36b   :  { %v449_v54 = vpop.permute.xlu1 %448 }
 0x36c   :  { %1318 = vpow2.f32 %v396_v53  ;;  %1231 = vmatprep.subr.mxu0 %v449_v54 }
 0x36d   :  { %1232 = vmatpush3.msra.mxu0 %v449_v54 }
 0x36e   :  { %1233 = vmatprep.subr.mxu0 %v447_v55 }
 0x36f   :  { %1234 = vmatpush3.msra.mxu0 %v447_v55  ;;  %v445_v56 = vpop.permute.xlu1 %444 }
 0x370   :  { %1235 = vmatprep.subr.mxu0 %v445_v56 }
 0x371   :  { %1236 = vmatpush3.msra.mxu0 %v445_v56 }
 0x379   :  { %v1319_v57 = vpop.eup %1318 }
 0x37a   :  { %v418_v58 = vsel %vm351_vm2, %v1319_v57, 0.0 }
 0x37b   :  { %419 = vadd.xlane.f32.xlu1 %v418_v58 }
 0x38c   :  { %440 = vrot.lane.b32.xlu1 %v1486_v10, %s1374_s26 }
 0x3c1   :  { %v405_v59 = vpop.xlane.xlu0 %404 }
 0x3c3   :  { %v402_v8 = vpop.xlane.xlu1 %401 }
 0x3c4   :  { %1320 = vrcp.f32 %v402_v8 }
 0x3c5   :  { %1322 = vrcp.f32 %v405_v59 }
 0x3c7   :  { %v408_v3 = vpop.xlane.xlu1 %407 }
 0x3c8   :  { %1324 = vrcp.f32 %v408_v3  ;;  %v764_v3 = vld [vmem:[%s1749_s8] sm:$0xff] }
 0x3cb   :  { %v411_v60 = vpop.xlane.xlu0 %410 }
 0x3cc   :  { %v414_v4 = vpop.xlane.xlu1 %413  ;;  %1326 = vrcp.f32 %v411_v60 }
 0x3cd   :  { %1328 = vrcp.f32 %v414_v4 }
 0x3cf   :  { %v417_v61 = vpop.xlane.xlu0 %416 }
 0x3d0   :  { %1330 = vrcp.f32 %v417_v61 }
 0x3d1   :  { %v1321_v62 = vpop.eup %1320 }
 0x3d2   :  { %v432_v63 = vmul.f32 %v1321_v62, %v1307_v36  ;;  %v1323_v6 = vpop.eup %1322 }
 0x3d3   :  { %v423_v0 = vpop.xlane.xlu0 %422  ;;  %v433_v17 = vmul.f32 %v1323_v6, %v1593_v32 }
 0x3d4   :  { %1241 = vmatprep.mubr.msk.f32.mxu0 %vm351_vm2, %v432_v63  ;;  %1332 = vrcp.f32 %v423_v0  ;;  %v766_v0 = vld [vmem:[%s1749_s8 + $0x10] sm:$0xff] }
 0x3d5   :  { %v1325_v7 = vpop.eup %1324 }
 0x3d6   :  { %v434_v11 = vmul.f32 %v1325_v7, %v1598_v40 }
 0x3d7   :  { %v443_v1 = vpop.permute.xlu0 %442 }
 0x3d8   :  { %1237 = vmatprep.subr.mxu0 %v443_v1 }
 0x3d9   :  { %1238 = vmatpush3.msra.mxu0 %v443_v1  ;;  %v1327_v12 = vpop.eup %1326  ;;  %v765_v1 = vld [vmem:[%s1749_s8 + $0x8] sm:$0xff] }
 0x3da   :  { %v1329_v13 = vpop.eup %1328  ;;  %v435_v15 = vmul.f32 %v1327_v12, %v1602_v43 }
 0x3db   :  { %v436_v19 = vmul.f32 %v1329_v13, %v1604_v44 }
 0x3dd   :  { %v1331_v18 = vpop.eup %1330 }
 0x3de   :  { %v437_v21 = vmul.f32 %v1331_v18, %v1610_v47  ;;  %v1111_v47 = vld [vmem:[%s1746_s5] ss:$0 sm:$0xff] }
 0x3e1   :  { %v1333_v20 = vpop.eup %1332 }
 0x3e2   :  { %v439_v24 = vmul.f32 %v1333_v20, %v1614_v49 }
 0x404   :  { %v420_v10 = vpop.xlane.xlu1 %419 }
 0x405   :  { %1334 = vrcp.f32 %v420_v10 }
 0x408   :  { %v441_v9 = vpop.permute.xlu1 %440 }
 0x409   :  { %1239 = vmatprep.subr.mxu0 %v441_v9 }
 0x40a   :  { %1240 = vmatpush3.msra.mxu0 %v441_v9 }
 0x40b   :  { %1242 = vmatmul.mubr.msk.f32.vlgmr.msra.gmra.mxu0 %vm351_vm2, %v433_v17  ;;  %1253 = vmatprep.subr.mxu0 %v628_v25 }
 0x40c   :  { %1244 = vmatprep.mubr.msk.f32.mxu0 %vm351_vm2, %v434_v11  ;;  %1254 = vmatpush3.msra.mxu0 %v628_v25  ;;  %v1114_v11 = vld [vmem:[%s1747_s6] ss:$0 sm:$0xff]  ;;  %v922_v25 = vld [vmem:[%s1751_s10 + $0x30] sm:$0xff] }
 0x40d   :  { %1255 = vmatprep.subr.mxu0 %v627_v26 }
 0x40e   :  { %1256 = vmatpush3.msra.mxu0 %v627_v26  ;;  %v921_v26 = vld [vmem:[%s1751_s10 + $0x28] sm:$0xff] }
 0x40f   :  { %1245 = vmatmul.mubr.msk.f32.gmra.mxu0 %vm351_vm2, %v435_v15  ;;  %1257 = vmatprep.subr.mxu0 %v626_v27  ;;  %v1115_v15 = vld [vmem:[%s1748_s7] ss:$0 sm:$0xff] }
 0x410   :  { %1247 = vmatprep.mubr.msk.f32.mxu0 %vm351_vm2, %v436_v19  ;;  %1258 = vmatpush3.msra.mxu0 %v626_v27  ;;  %v920_v27 = vld [vmem:[%s1751_s10 + $0x20] sm:$0xff] }
 0x411   :  { %1259 = vmatprep.subr.mxu0 %v625_v14 }
 0x412   :  { %v1335_v22 = vpop.eup %1334  ;;  %1260 = vmatpush3.msra.mxu0 %v625_v14  ;;  %v919_v14 = vld [vmem:[%s1751_s10 + $0x18] sm:$0xff] }
 0x413   :  { %1248 = vmatmul.mubr.msk.f32.gmra.mxu0 %vm351_vm2, %v437_v21  ;;  %v438_v23 = vmul.f32 %v1335_v22, %v1319_v57 }
 0x415   :  { %1250 = vmatprep.mubr.msk.f32.mxu0 %vm351_vm2, %v438_v23 }
 0x417   :  { %1251 = vmatmul.mubr.msk.f32.gmra.mxu0 %vm351_vm2, %v439_v24  ;;  %v923_v24 = vld [vmem:[%s1751_s10 + $0x38] sm:$0xff] }
 0x418   :  { %1275 = vmatprep.subr.mxu1 %v923_v24 }
 0x419   :  { %1276 = vmatpush3.msra.mxu1 %v923_v24 }
 0x41a   :  { %1277 = vmatprep.subr.mxu1 %v922_v25 }
 0x41b   :  { %1278 = vmatpush3.msra.mxu1 %v922_v25 }
 0x41c   :  { %1279 = vmatprep.subr.mxu1 %v921_v26 }
 0x41d   :  { %1280 = vmatpush3.msra.mxu1 %v921_v26 }
 0x41e   :  { %1281 = vmatprep.subr.mxu1 %v920_v27 }
 0x41f   :  { %1282 = vmatpush3.msra.mxu1 %v920_v27 }
 0x420   :  { %1283 = vmatprep.subr.mxu1 %v919_v14 }
 0x421   :  { %1284 = vmatpush3.msra.mxu1 %v919_v14 }
 0x4cb   :  { %v1243_v28 = vpop.f32.mrf.mxu0 }
 0x4cd   :  { %v554_v29 = vpop.f32.mrf.mxu0 }
 0x4cf   :  { %v1246_v16 = vpop.f32.mrf.mxu0 }
 0x4d0   :  { %597 = vrot.lane.b32.xlu1 %v1246_v16, %s1375_s17  ;;  %v916_v16 = vld [vmem:[%s1751_s10] sm:$0xff] }
 0x4d1   :  { %v564_v30 = vpop.f32.mrf.mxu0 }
 0x4d2   :  { %595 = vrot.lane.b32.xlu0 %v564_v30, %s1375_s17  ;;  %v1116_v30 = vld [vmem:[%s1750_s9] ss:$0 sm:$0xff] }
 0x4d3   :  { %v1249_v31 = vpop.f32.mrf.mxu0 }
 0x4d4   :  { %605 = vrot.lane.b32.xlu1 %v1249_v31, %s1376_s18 }
 0x4d5   :  { %v574_v32 = vpop.f32.mrf.mxu0 }
 0x4d6   :  { %603 = vrot.lane.b32.xlu0 %v574_v32, %s1376_s18 }
 0x4d7   :  { %v1252_v33 = vpop.f32.mrf.mxu0 }
 0x4d8   :  { %613 = vrot.lane.b32.xlu1 %v1252_v33, %s1377_s19 }
 0x4d9   :  { %v584_v34 = vpop.f32.mrf.mxu0 }
 0x4da   :  { %611 = vrot.lane.b32.xlu0 %v584_v34, %s1377_s19 }
 0x542   :  { %v598_v35 = vpop.permute.xlu1 %597 }
 0x543   :  { %v618_v41 = vsel %vm181_vm1, %v1243_v28, %v598_v35  ;;  %v918_v28 = vld [vmem:[%s1751_s10 + $0x10] sm:$0xff] }
 0x544   :  { %v596_v36 = vpop.permute.xlu0 %595  ;;  %1285 = vmatprep.subr.mxu1 %v918_v28 }
 0x545   :  { %v617_v39 = vsel %vm181_vm1, %v554_v29, %v596_v36  ;;  %1286 = vmatpush3.msra.mxu1 %v918_v28  ;;  %v917_v29 = vld [vmem:[%s1751_s10 + $0x8] sm:$0xff] }
 0x546   :  { %v606_v37 = vpop.permute.xlu1 %605  ;;  %1287 = vmatprep.subr.mxu1 %v917_v29 }
 0x547   :  { %v621_v44 = vsel %vm619_vm3, %v618_v41, %v606_v37  ;;  %1288 = vmatpush3.msra.mxu1 %v917_v29 }
 0x548   :  { %v604_v38 = vpop.permute.xlu0 %603  ;;  %1289 = vmatprep.subr.mxu1 %v916_v16 }
 0x549   :  { %v620_v42 = vsel %vm619_vm3, %v617_v39, %v604_v38  ;;  %1290 = vmatpush3.msra.mxu1 %v916_v16 }
 0x54a   :  { %v614_v40 = vpop.permute.xlu1 %613 }
 0x54b   :  { %v624_v46 = vsel %vm622_vm4, %v621_v44, %v614_v40 }
 0x54c   :  { %v612_v43 = vpop.permute.xlu0 %611 }
 0x54d   :  { %v623_v45 = vsel %vm622_vm4, %v620_v42, %v612_v43 }
 0x54e   :  { %1261 = vmatprep.mubr.msk.f32.mxu0 %vm69_vm0, %v623_v45 }
 0x54f   :  { %1262 = vmatmul.mubr.msk.f32.vlgmr.msra.gmra.mxu0 %vm69_vm0, %v624_v46 }
 0x60f   :  { %v1263_v48 = vpop.f32.mrf.mxu0 }
 0x610   :  { %v714_v49 = vadd.f32 %v1263_v48, %v1111_v47 }
 0x611   :  { %v708_v50 = vpop.f32.mrf.mxu0 }
 0x612   :  { %v709_v51 = vadd.f32 %v1111_v47, %v708_v50  ;;  %v718_v52 = vadd.f32 %v714_v49, %v1477_v5 }
 0x614   :  { %v724_v53 = vsel %vm69_vm0, %v718_v52, 0.0  ;;  %v717_v54 = vadd.f32 %v709_v51, %v1464_v2  ;;  %v767_v2 = vld [vmem:[%s1749_s8 + $0x18] sm:$0xff] }
 0x615   :  { %725 = vadd.xlane.f32.xlu1 %v724_v53  ;;  %1264 = vmatprep.subr.mxu0 %v767_v2 }
 0x616   :  { %v721_v55 = vsel %vm69_vm0, %v717_v54, 0.0  ;;  %1265 = vmatpush3.msra.mxu0 %v767_v2 }
 0x617   :  { %722 = vadd.xlane.f32.xlu0 %v721_v55  ;;  %1266 = vmatprep.subr.mxu0 %v766_v0 }
 0x618   :  { %1267 = vmatpush3.msra.mxu0 %v766_v0 }
 0x619   :  { %1268 = vmatprep.subr.mxu0 %v765_v1 }
 0x61a   :  { %1269 = vmatpush3.msra.mxu0 %v765_v1 }
 0x61b   :  { %1270 = vmatprep.subr.mxu0 %v764_v3 }
 0x61c   :  { %1271 = vmatpush3.msra.mxu0 %v764_v3 }
 0x69e   :  { %v726_v56 = vpop.xlane.xlu1 %725 }
 0x69f   :  { %v729_v57 = vmul.f32 0.03125, %v726_v56 }
 0x6a0   :  { %v723_v58 = vpop.xlane.xlu0 %722 }
 0x6a1   :  { %v728_v8 = vmul.f32 0.03125, %v723_v58  ;;  %v731_v59 = vsub.f32 %v718_v52, %v729_v57 }
 0x6a3   :  { %v730_v60 = vsub.f32 %v717_v54, %v728_v8  ;;  %v733_v63 = vmul.f32 %v731_v59, %v731_v59 }
 0x6a5   :  { %v732_v61 = vmul.f32 %v730_v60, %v730_v60  ;;  %v737_v5 = vsel %vm69_vm0, %v733_v63, 0.0 }
 0x6a7   :  { %v734_v62 = vsel %vm69_vm0, %v732_v61, 0.0 }
 0x6a8   :  { %735 = vadd.xlane.f32.xlu0 %v734_v62 }
 0x6ac   :  { %738 = vadd.xlane.f32.xlu0 %v737_v5 }
 0x731   :  { %v736_v4 = vpop.xlane.xlu0 %735 }
 0x732   :  { %v740_v10 = vmul.f32 0.03125, %v736_v4 }
 0x734   :  { %v742_v6 = vadd.f32 1e-12, %v740_v10 }
 0x735   :  { %v739_v7 = vpop.xlane.xlu0 %738 }
 0x736   :  { %1336 = vrsqrt.f32 %v742_v6  ;;  %v741_v9 = vmul.f32 0.03125, %v739_v7 }
 0x738   :  { %v743_v17 = vadd.f32 1e-12, %v741_v9 }
 0x73a   :  { %1338 = vrsqrt.f32 %v743_v17 }
 0x743   :  { %v1337_v12 = vpop.eup %1336 }
 0x744   :  { %v746_v13 = vmul.f32 %v1337_v12, %v730_v60 }
 0x746   :  { %v754_v18 = vmul.f32 %v1114_v11, %v746_v13 }
 0x747   :  { %v1339_v19 = vpop.eup %1338 }
 0x748   :  { %v747_v20 = vmul.f32 %v1339_v19, %v731_v59  ;;  %v1683_v21 = vadd.f32 %v1115_v15, %v754_v18 }
 0x74a   :  { %v755_v22 = vmul.f32 %v1114_v11, %v747_v20  ;;  %1272 = vmatprep.mubr.msk.f32.mxu0 %vm69_vm0, %v1683_v21 }
 0x74c   :  { %v1687_v23 = vadd.f32 %v1115_v15, %v755_v22 }
 0x74e   :  { %1273 = vmatmul.mubr.msk.f32.vlgmr.msra.gmra.mxu0 %vm69_vm0, %v1687_v23 }
 0x80e   :  { %v1274_v31 = vpop.f32.mrf.mxu0 }
 0x80f   :  { %v853_v32 = vadd.f32 %v1274_v31, %v1116_v30  ;;  %v1121_v31 = vld [vmem:[%s1752_s11] ss:$0 sm:$0xff] }
 0x810   :  { %v847_v33 = vpop.f32.mrf.mxu0 }
 0x811   :  { %v859_v34 = vmul.f32 0.70710677, %v853_v32  ;;  %v848_v35 = vadd.f32 %v1116_v30, %v847_v33  ;;  %v857_v29 = vmul.f32 0.5, %v853_v32 }
 0x813   :  { %v1120_v36 = vclamps-f32 %v859_v34, 3.832507  ;;  %v858_v37 = vmul.f32 0.70710677, %v848_v35  ;;  %v856_v14 = vmul.f32 0.5, %v848_v35 }
 0x815   :  { %v865_v38 = vmul.f32 %v1120_v36, %v1120_v36  ;;  %v1119_v39 = vclamps-f32 %v858_v37, 3.832507 }
 0x817   :  { %v883_v40 = vmul.f32 -1.1791603e-07, %v865_v38  ;;  %v864_v41 = vmul.f32 %v1119_v39, %v1119_v39  ;;  %v867_v44 = vmul.f32 0.00022905065, %v865_v38 }
 0x819   :  { %v885_v42 = vadd.f32 2.3547966e-05, %v883_v40  ;;  %v882_v43 = vmul.f32 -1.1791603e-07, %v864_v41  ;;  %v866_v48 = vmul.f32 0.00022905065, %v864_v41 }
 0x81a   :  { %v869_v50 = vadd.f32 0.003408291, %v867_v44 }
 0x81b   :  { %v887_v45 = vmul.f32 %v885_v42, %v865_v38  ;;  %v884_v46 = vadd.f32 2.3547966e-05, %v882_v43  ;;  %v868_v54 = vadd.f32 0.003408291, %v866_v48 }
 0x81c   :  { %v871_v56 = vmul.f32 %v869_v50, %v865_v38 }
 0x81d   :  { %v889_v47 = vadd.f32 0.0010179626, %v887_v45  ;;  %v886_v49 = vmul.f32 %v884_v46, %v864_v41  ;;  %v870_v59 = vmul.f32 %v868_v54, %v864_v41 }
 0x81e   :  { %v873_v61 = vadd.f32 0.050955694, %v871_v56 }
 0x81f   :  { %v891_v51 = vmul.f32 %v889_v47, %v865_v38  ;;  %v888_v52 = vadd.f32 0.0010179626, %v886_v49  ;;  %v872_v2 = vadd.f32 0.050955694, %v870_v59 }
 0x820   :  { %v875_v1 = vmul.f32 %v873_v61, %v865_v38 }
 0x821   :  { %v893_v53 = vadd.f32 0.01407047, %v891_v51  ;;  %v890_v55 = vmul.f32 %v888_v52, %v864_v41  ;;  %v874_v6 = vmul.f32 %v872_v2, %v864_v41 }
 0x822   :  { %v877_v9 = vadd.f32 0.18520832, %v875_v1 }
 0x823   :  { %v895_v57 = vmul.f32 %v893_v53, %v865_v38  ;;  %v892_v58 = vadd.f32 0.01407047, %v890_v55  ;;  %v876_v12 = vadd.f32 0.18520832, %v874_v6  ;;  %v1124_v55 = vld [vmem:[%s1753_s12] ss:$0 sm:$0xff] }
 0x824   :  { %v879_v11 = vmul.f32 %v877_v9, %v865_v38 }
 0x825   :  { %v897_v8 = vadd.f32 0.11098505, %v895_v57  ;;  %v894_v60 = vmul.f32 %v892_v58, %v864_v41  ;;  %v878_v13 = vmul.f32 %v876_v12, %v864_v41  ;;  %v1125_v58 = vld [vmem:[%s1754_s13] ss:$0 sm:$0xff] }
 0x826   :  { %v881_v15 = vadd.f32 1.1283791, %v879_v11 }
 0x827   :  { %v899_v62 = vmul.f32 %v897_v8, %v865_v38  ;;  %v896_v63 = vadd.f32 0.11098505, %v894_v60  ;;  %v880_v18 = vadd.f32 1.1283791, %v878_v13 }
 0x828   :  { %v907_v19 = vmul.f32 %v1120_v36, %v881_v15 }
 0x829   :  { %v901_v5 = vadd.f32 0.49746925, %v899_v62  ;;  %v898_v0 = vmul.f32 %v896_v63, %v864_v41  ;;  %v906_v24 = vmul.f32 %v1119_v39, %v880_v18 }
 0x82b   :  { %v903_v3 = vmul.f32 %v901_v5, %v865_v38  ;;  %v900_v4 = vadd.f32 0.49746925, %v898_v0 }
 0x82d   :  { %v905_v10 = vadd.f32 1.0, %v903_v3  ;;  %v902_v7 = vmul.f32 %v900_v4, %v864_v41 }
 0x82f   :  { %1340 = vrcp.f32 %v905_v10  ;;  %v904_v17 = vadd.f32 1.0, %v902_v7 }
 0x831   :  { %1342 = vrcp.f32 %v904_v17 }
 0x83c   :  { %v1341_v20 = vpop.eup %1340 }
 0x83d   :  { %v911_v22 = vmul.f32 %v1341_v20, %v907_v19 }
 0x83e   :  { %v1343_v25 = vpop.eup %1342 }
 0x83f   :  { %v910_v26 = vmul.f32 %v1343_v25, %v906_v24  ;;  %v913_v27 = vadd.f32 1.0, %v911_v22 }
 0x841   :  { %v912_v28 = vadd.f32 1.0, %v910_v26  ;;  %v915_v30 = vmul.f32 %v913_v27, %v857_v29 }
 0x843   :  { %v914_v16 = vmul.f32 %v912_v28, %v856_v14 }
 0x845   :  { %1291 = vmatprep.mubr.msk.f32.mxu1 %vm351_vm2, %v914_v16 }
 0x846   :  { %1292 = vmatmul.mubr.msk.f32.vlgmr.msra.gmra.mxu1 %vm351_vm2, %v915_v30 }
 0x906   :  { %v1293_v33 = vpop.f32.mrf.mxu1 }
 0x907   :  { %v1009_v34 = vadd.f32 %v1293_v33, %v1121_v31 }
 0x908   :  { %v1003_v36 = vpop.f32.mrf.mxu1 }
 0x909   :  { %v1004_v37 = vadd.f32 %v1121_v31, %v1003_v36  ;;  %v1013_v38 = vadd.f32 %v1009_v34, %v1687_v23 }
 0x90b   :  { %v1019_v35 = vsel %vm69_vm0, %v1013_v38, 0.0  ;;  %v1012_v32 = vadd.f32 %v1004_v37, %v1683_v21 }
 0x90c   :  { %1020 = vadd.xlane.f32.xlu0 %v1019_v35 }
 0x90d   :  { %v1016_v39 = vsel %vm69_vm0, %v1012_v32, 0.0 }
 0x90e   :  { %1017 = vadd.xlane.f32.xlu1 %v1016_v39 }
 0x995   :  { %v1021_v40 = vpop.xlane.xlu0 %1020 }
 0x996   :  { %v1023_v41 = vmul.f32 0.03125, %v1021_v40 }
 0x997   :  { %v1018_v42 = vpop.xlane.xlu1 %1017 }
 0x998   :  { %v1025_v43 = vsub.f32 %v1013_v38, %v1023_v41  ;;  %v1022_v44 = vmul.f32 0.03125, %v1018_v42 }
 0x99a   :  { %v1024_v45 = vsub.f32 %v1012_v32, %v1022_v44  ;;  %v1027_v46 = vmul.f32 %v1025_v43, %v1025_v43 }
 0x99c   :  { %v1031_v47 = vsel %vm69_vm0, %v1027_v46, 0.0  ;;  %v1026_v48 = vmul.f32 %v1024_v45, %v1024_v45 }
 0x99d   :  { %1032 = vadd.xlane.f32.xlu0 %v1031_v47 }
 0x99e   :  { %v1028_v23 = vsel %vm69_vm0, %v1026_v48, 0.0 }
 0x99f   :  { %1029 = vadd.xlane.f32.xlu1 %v1028_v23 }
 0xa26   :  { %v1033_v49 = vpop.xlane.xlu0 %1032 }
 0xa27   :  { %v1035_v21 = vmul.f32 0.03125, %v1033_v49 }
 0xa28   :  { %v1030_v50 = vpop.xlane.xlu1 %1029 }
 0xa29   :  { %v1037_v51 = vadd.f32 1e-12, %v1035_v21  ;;  %v1034_v52 = vmul.f32 0.03125, %v1030_v50 }
 0xa2b   :  { %1344 = vrsqrt.f32 %v1037_v51  ;;  %v1036_v53 = vadd.f32 1e-12, %v1034_v52 }
 0xa2d   :  { %1346 = vrsqrt.f32 %v1036_v53 }
 0xa38   :  { %v1345_v54 = vpop.eup %1344 }
 0xa39   :  { %v1041_v56 = vmul.f32 %v1345_v54, %v1025_v43 }
 0xa3a   :  { %v1347_v57 = vpop.eup %1346 }
 0xa3b   :  { %v1040_v8 = vmul.f32 %v1347_v57, %v1024_v45  ;;  %v1049_v59 = vmul.f32 %v1124_v55, %v1041_v56 }
 0xa3d   :  { %v1048_v60 = vmul.f32 %v1124_v55, %v1040_v8  ;;  %v1057_v61 = vadd.f32 %v1125_v58, %v1049_v59 }
 0xa3f   :  { %v1056_v62 = vadd.f32 %v1125_v58, %v1048_v60  ;;  %1059 = vst.msk [vmem:[#allocation2 + $0x8] sm:$0xff] %vm69_vm0, %v1057_v61 }
 0xa41   :  { %1058 = vst.msk [vmem:[#allocation2] sm:$0xff] %vm69_vm0, %v1056_v62 }
 0xa42   :  { %1359 = shalt.err (!%p1356_p4)
}
 0xa43   :  { %s1379_s12 = smov 128  }
 0xa44   :  { %1071 = dma.vmem_to_hbm [thread:$0]  %s1066_s3, 256, %s1755_s14, [#allocation3], %s1379_s12, %s1379_s12, %s1375_s17  }
 0xa45   :  { %1368 = dma.done.wait [#allocation3], 256  }
 0xa46   :  { %1369 = vsyncadd [#allocation3], 4294967040 }
 0xa47   :  { %1075 = vsyncpa [#allocation3], 1 }

</bundles_post_ra>
